<compile_context>
chip_gen: v6e
topology: v6e:2x2x1
jax: 0.10.0
libtpu: 0.0.40
codegen_flags: <defaults>
</compile_context>

<pallas_src>
import functools
import math

import jax
import jax.numpy as jnp
from jax import lax
from jax.experimental import pallas as pl
from jax.experimental.pallas import tpu as pltpu


LAMBD = 0.05
EPS_SHRINK = 1e-12
EPS_NORM = 1e-12
NEG_INF = -1e30   # finite masked score: exp(NEG_INF - max) == 0, no inf-inf NaN


def _round_up(a, b):
    return (a + b - 1) // b * b


def _cdiv(a, b):
    return (a + b - 1) // b


def _vmem_budget_bytes():
    """Generation-aware VMEM ceiling (v5e/v6e: 128 MiB, v7x: 64 MiB physical)."""
    try:
        cap = int(pltpu.get_tpu_info().vmem_capacity_bytes)
    except Exception:
        cap = 64 << 20            # conservative (v7x-sized) default
    return int(0.75 * cap)


def _attention_chain(scores, *, approx, valid_mem):
    """softmax(dim=1) -> hard_shrink_relu(lambd=0.05) -> L1 normalize(dim=1).

    `scores` is f32 (tm, mem_pad).  `valid_mem` (int or None) masks padded
    memory slots when mem_dim was zero-padded up to a multiple of 128."""
    if valid_mem is not None:
        col = lax.broadcasted_iota(jnp.int32, scores.shape, 1)
        scores = jnp.where(col < valid_mem, scores, NEG_INF)

    # Softmax denominator kept exact so the 0.05 hard-shrink threshold decision
    # matches the f32 reference; post-threshold denominators may use the
    # (nearly free) EUP approx reciprocal in the bf16 fast path.
    m = jnp.max(scores, axis=1, keepdims=True)
    e = jnp.exp(scores - m)
    att = e * pl.reciprocal(jnp.sum(e, axis=1, keepdims=True), approx=False)

    # hard_shrink_relu(a, l) = relu(a - l) * a / (|a - l| + eps)
    shifted = att - LAMBD
    att = (jnp.maximum(shifted, 0.0) * att
           * pl.reciprocal(jnp.abs(shifted) + EPS_SHRINK, approx=approx))

    # F.normalize(p=1, dim=1): att >= 0 after the relu-style shrink, so the L1
    # sum needs no abs (keep this invariant if the shrink ever changes!).
    l1 = jnp.sum(att, axis=1, keepdims=True)
    att = att * pl.reciprocal(jnp.maximum(l1, EPS_NORM), approx=approx)
    return att


# ----------------------------------------------------------------------------
# Single-pass kernel: whole fea_dim per block, weight resident in VMEM.
# ----------------------------------------------------------------------------
def _memory_unit_kernel(x_ref, w_ref, out_ref, att_ref, *, approx, valid_mem):
    w = w_ref[...]                         # (mem_pad, fea) operand dtype (resident)
    x = x_ref[...].astype(w.dtype)         # cast AFTER the DMA (no wrapper cast)

    # scores = x @ W^T: contract the last dim of BOTH operands (no transpose).
    scores = lax.dot_general(
        x, w, dimension_numbers=(((1,), (1,)), ((), ())),
        preferred_element_type=jnp.float32)             # (tm, mem_pad) f32

    att = _attention_chain(scores, approx=approx, valid_mem=valid_mem)

    out = jnp.dot(att.astype(w.dtype), w, preferred_element_type=jnp.float32)
    out_ref[...] = out.astype(out_ref.dtype)
    att_ref[...] = att.astype(att_ref.dtype)


# ----------------------------------------------------------------------------
# fea_dim (K)-tiled kernel: two phases over the same K tiles.
#   phase 0 (j <  k_steps): scores += x[:, k] @ W[:, k]^T  (VMEM accumulator)
#   phase 1 (j >= k_steps): out[:, k] = att @ W[:, k]
# ----------------------------------------------------------------------------
def _memory_unit_kernel_ktiled(x_ref, w_ref, out_ref, att_ref,
                               scores_scr, attc_scr, *, k_steps, approx,
                               valid_mem):
    j = pl.program_id(1)
    w = w_ref[...]                          # (mem_pad, tk) operand dtype

    @pl.when(j == 0)
    def _():
        scores_scr[...] = jnp.zeros_like(scores_scr)

    @pl.when(j < k_steps)
    def _():
        x = x_ref[...].astype(w.dtype)
        scores_scr[...] += lax.dot_general(
            x, w, dimension_numbers=(((1,), (1,)), ((), ())),
            preferred_element_type=jnp.float32)

    @pl.when(j == k_steps)                  # finalize att once per batch tile
    def _():
        att = _attention_chain(scores_scr[...], approx=approx,
                               valid_mem=valid_mem)
        att_ref[...] = att.astype(att_ref.dtype)
        attc_scr[...] = att.astype(attc_scr.dtype)

    @pl.when(j >= k_steps)
    def _():
        out_ref[...] = jnp.dot(
            attc_scr[...], w, preferred_element_type=jnp.float32
        ).astype(out_ref.dtype)


# ----------------------------------------------------------------------------
# Wrappers
# ----------------------------------------------------------------------------
def prepare_memory_weight(weight, use_bf16=True):
    """One-time, parameter-level cast of the memory weight to the MXU operand
    dtype.  Cache the result across calls: a per-call wrapper cast would cost
    an extra f32-read + bf16-write HBM round trip on every forward."""
    return weight.astype(jnp.bfloat16) if use_bf16 else weight


def memory_unit_forward(x_nchw, weight, *, block_n=256, out_dtype=None,
                        max_fea_block=None):
    """MemoryUnit forward.

    x_nchw : (N, C, H, W) float32 activations (cast to the operand dtype
             inside the kernel, after the DMA).
    weight : (mem_dim, fea_dim); f32 for the exact path, bf16 (via
             prepare_memory_weight) for the fast path.  Its dtype is the MXU
             operand dtype.
    out_dtype : dtype of the (N, fea_dim, 1) output.  None -> bf16 when the
             weight is bf16 (halves the dominant HBM write), else f32.
    """
    n = x_nchw.shape[0]
    fea_dim = int(math.prod(x_nchw.shape[1:]))
    mem_dim, w_fea = weight.shape
    assert w_fea == fea_dim

    x = x_nchw.reshape(n, fea_dim)          # torch.flatten(input, start_dim=1)

    op_dtype = jnp.dtype(weight.dtype)
    approx = op_dtype == jnp.dtype(jnp.bfloat16)
    if out_dtype is None:
        out_dtype = jnp.bfloat16 if approx else jnp.float32
    out_dtype = jnp.dtype(out_dtype)

    # Lane-dense memory axis: pad mem_dim to a multiple of 128 with zero rows;
    # padded score columns are masked before softmax.  (Ideally fold this into
    # the parameter-level prep alongside the bf16 cast.)
    mem_pad = _round_up(mem_dim, 128)
    if mem_pad != mem_dim:
        weight = jnp.pad(weight, ((0, mem_pad - mem_dim), (0, 0)))
        valid_mem = mem_dim
    else:
        valid_mem = None

    # Batch tiling: multiple of 8 (sublane), and >= 2 grid steps whenever N
    # allows so v7x's two TensorCores both get work and the BlockSpec pipeline
    # overlaps DMA with compute.  No wrapper-side pad: the ragged last tile is
    # handled by Pallas block masking.
    block_n = _round_up(max(int(block_n), 8), 8)
    tm = max(8, min(block_n, _round_up(_cdiv(n, 2), 8)))
    grid_n = _cdiv(n, tm)

    budget = _vmem_budget_bytes()
    x_it = jnp.dtype(x.dtype).itemsize
    w_it = op_dtype.itemsize
    o_it = out_dtype.itemsize

    def single_pass_bytes():
        return (2 * tm * fea_dim * x_it          # x tiles (double-buffered)
                + 2 * mem_pad * fea_dim * w_it   # weight (2 bufs, conservative)
                + 2 * tm * fea_dim * o_it        # out tiles
                + 2 * tm * mem_pad * 4)          # att tiles (f32)

    def ktiled_bytes(tk):
        return (2 * tm * tk * x_it + 2 * mem_pad * tk * w_it
                + 2 * tm * tk * o_it + 2 * tm * mem_pad * 4
                + tm * mem_pad * 4 + tm * mem_pad * w_it)   # scratches

    # Use the K-tiled fallback when the resident-weight design would blow the
    # VMEM budget (v7x hits this at roughly half the fea_dim of v5e/v6e), or
    # when explicitly requested.
    fea_cap = fea_dim if max_fea_block is None else int(max_fea_block)
    use_ktiled = (single_pass_bytes() > budget) or (fea_cap < fea_dim)
    tk = None
    if use_ktiled:
        cands = [t for t in range(128, fea_dim + 1, 128)
                 if fea_dim % t == 0 and t <= fea_cap
                 and ktiled_bytes(t) <= budget]
        if cands:
            tk = max(cands)
        else:
            # TODO(synk): fea_dim with no VMEM-fitting multiple-of-128 divisor
            # would need a masked ragged K tile; fall back to the resident path.
            use_ktiled = False

    out_struct = jax.ShapeDtypeStruct((n, fea_dim), out_dtype)
    att_struct = jax.ShapeDtypeStruct((n, mem_pad), jnp.float32)

    if not use_ktiled:
        vmem_limit = int(min(max(single_pass_bytes() + (4 << 20), 16 << 20),
                             budget))
        kernel = functools.partial(_memory_unit_kernel, approx=approx,
                                   valid_mem=valid_mem)
        out, att = pl.pallas_call(
            kernel,
            out_shape=(out_struct, att_struct),
            grid=(grid_n,),
            in_specs=[
                pl.BlockSpec((tm, fea_dim), lambda i: (i, 0)),
                # Constant block index -> weight stays resident, not re-DMA'd.
                pl.BlockSpec((mem_pad, fea_dim), lambda i: (0, 0)),
            ],
            out_specs=(
                pl.BlockSpec((tm, fea_dim), lambda i: (i, 0)),
                pl.BlockSpec((tm, mem_pad), lambda i: (i, 0)),
            ),
            compiler_params=pltpu.CompilerParams(
                dimension_semantics=("parallel",),
                vmem_limit_bytes=vmem_limit,
            ),
        )(x, weight)
    else:
        k_steps = fea_dim // tk
        vmem_limit = int(min(max(ktiled_bytes(tk) + (4 << 20), 16 << 20),
                             budget))
        kernel = functools.partial(_memory_unit_kernel_ktiled, k_steps=k_steps,
                                   approx=approx, valid_mem=valid_mem)
        out, att = pl.pallas_call(
            kernel,
            out_shape=(out_struct, att_struct),
            grid=(grid_n, 2 * k_steps),
            in_specs=[
                # x: walk K tiles in phase 0, hold the last tile in phase 1
                # (no re-DMA of x during the output pass).
                pl.BlockSpec((tm, tk),
                             lambda i, j: (i, jnp.minimum(j, k_steps - 1))),
                # W: same K tile sequence in both phases.
                pl.BlockSpec((mem_pad, tk),
                             lambda i, j: (0, jnp.where(j < k_steps, j,
                                                        j - k_steps))),
            ],
            out_specs=(
                # out blocks only advance in phase 1 (each written exactly once).
                pl.BlockSpec((tm, tk),
                             lambda i, j: (i, jnp.where(j < k_steps, 0,
                                                        j - k_steps))),
                pl.BlockSpec((tm, mem_pad), lambda i, j: (i, 0)),
            ),
            scratch_shapes=[
                pltpu.VMEM((tm, mem_pad), jnp.float32),   # scores accumulator
                pltpu.VMEM((tm, mem_pad), op_dtype),      # att in operand dtype
            ],
            compiler_params=pltpu.CompilerParams(
                dimension_semantics=("parallel", "arbitrary"),
                vmem_limit_bytes=vmem_limit,
            ),
        )(x, weight)

    if mem_pad != mem_dim:
        att = att[:, :mem_dim]

    return {"output": out[..., None], "att": att}   # output: (N, fea_dim, 1)


if __name__ == "__main__":
    # Small shapes consistent with the module: NCHW input -> fea_dim = C*H*W.
    N, C, H, W = 2, 4, 16, 16
    FEA_DIM = C * H * W          # 1024
    MEM_DIM = 128

    key = jax.random.PRNGKey(0)
    kx, kw = jax.random.split(key)

    x = jax.random.normal(kx, (N, C, H, W), dtype=jnp.float32)

    # reset_parameters(): uniform(-stdv, stdv) with stdv = 1/sqrt(fea_dim)
    stdv = 1.0 / math.sqrt(FEA_DIM)
    weight = jax.random.uniform(
        kw, (MEM_DIM, FEA_DIM), minval=-stdv, maxval=stdv, dtype=jnp.float32)

    # Pure-JAX reference (same math as the PyTorch module), parameterized by
    # the MXU operand dtype so the bf16 fast path is checked like-for-like.
    def reference(x_nchw, w, compute_dtype):
        nb = x_nchw.shape[0]
        fd = int(math.prod(x_nchw.shape[1:]))
        xf = x_nchw.reshape(nb, fd).astype(compute_dtype)
        wc = w.astype(compute_dtype)
        scores = lax.dot_general(
            xf, wc, dimension_numbers=(((1,), (1,)), ((), ())),
            preferred_element_type=jnp.float32)
        att = jax.nn.softmax(scores, axis=1)
        sh = att - LAMBD
        att = jnp.maximum(sh, 0.0) * att / (jnp.abs(sh) + EPS_SHRINK)
        att = att / jnp.maximum(jnp.sum(jnp.abs(att), axis=1, keepdims=True),
                                EPS_NORM)
        out = jnp.dot(att.astype(compute_dtype), wc,
                      preferred_element_type=jnp.float32)
        return out[..., None], att

    # (1) Exact path: f32 weight, f32 MXU operands, f32 output.
    res = memory_unit_forward(x, weight)
    jax.block_until_ready(res)
    out_r, att_r = reference(x, weight, jnp.float32)
    assert res["output"].shape == (N, FEA_DIM, 1)
    assert res["att"].shape == (N, MEM_DIM)
    assert res["output"].dtype == jnp.float32
    assert jnp.allclose(res["output"], out_r, atol=1e-5, rtol=1e-5)
    assert jnp.allclose(res["att"], att_r, atol=1e-5, rtol=1e-5)

    # (2) Fast path: bf16 weight cached once at parameter level, bf16 output.
    w_bf16 = prepare_memory_weight(weight, use_bf16=True)
    res_bf = memory_unit_forward(x, w_bf16)
    jax.block_until_ready(res_bf)
    out_rb, att_rb = reference(x, weight, jnp.bfloat16)
    assert res_bf["output"].dtype == jnp.bfloat16
    assert jnp.allclose(res_bf["output"].astype(jnp.float32), out_rb,
                        atol=1e-3, rtol=1e-2)
    assert jnp.allclose(res_bf["att"], att_rb, atol=1e-3, rtol=1e-2)

    # (3) fea_dim-tiled fallback, forced so it is exercised at small shapes.
    res_kt = memory_unit_forward(x, weight, max_fea_block=256)
    jax.block_until_ready(res_kt)
    assert jnp.allclose(res_kt["output"], out_r, atol=1e-4, rtol=1e-4)
    assert jnp.allclose(res_kt["att"], att_r, atol=1e-4, rtol=1e-4)

    # (4) Non-multiple-of-128 mem_dim (zero-padded weight rows + score mask).
    MEM_DIM2 = 200
    w2 = jax.random.uniform(jax.random.PRNGKey(1), (MEM_DIM2, FEA_DIM),
                            minval=-stdv, maxval=stdv, dtype=jnp.float32)
    res2 = memory_unit_forward(x, w2)
    jax.block_until_ready(res2)
    out_r2, att_r2 = reference(x, w2, jnp.float32)
    assert res2["att"].shape == (N, MEM_DIM2)
    assert jnp.allclose(res2["output"], out_r2, atol=1e-5, rtol=1e-5)
    assert jnp.allclose(res2["att"], att_r2, atol=1e-5, rtol=1e-5)

    print("KERNEL_OK")
</pallas_src>

<mosaic_0001>
module attributes {stable_mosaic.version = 11 : i64} {
  func.func @_memory_unit_kernel(%arg0: i32, %arg1: memref<8x1024xf32, #tpu.memory_space<vmem>>, %arg2: memref<128x1024xf32, #tpu.memory_space<vmem>>, %arg3: memref<8x1024xf32, #tpu.memory_space<vmem>>, %arg4: memref<8x128xf32, #tpu.memory_space<vmem>>) attributes {dimension_semantics = [#tpu.dimension_semantics<parallel>], iteration_bounds = array<i64: 1>, scalar_prefetch = 0 : i64, scratch_operands = 0 : i64, tpu.core_type = #tpu.core_type<tc>, window_params = [{transform_indices = @transform_0, window_bounds = array<i64: 8, 1024>}, {pipeline_mode = #tpu.pipeline_mode<synchronous>, transform_indices = @transform_1, window_bounds = array<i64: 128, 1024>}, {transform_indices = @transform_2, window_bounds = array<i64: 8, 1024>}, {transform_indices = @transform_3, window_bounds = array<i64: 8, 128>}]} {
    %c0 = arith.constant 0 : index
    %c0_0 = arith.constant 0 : index
    %0 = vector.load %arg2[%c0, %c0_0] : memref<128x1024xf32, #tpu.memory_space<vmem>>, vector<128x1024xf32>
    %c0_1 = arith.constant 0 : index
    %c0_2 = arith.constant 0 : index
    %1 = vector.load %arg1[%c0_1, %c0_2] : memref<8x1024xf32, #tpu.memory_space<vmem>>, vector<8x1024xf32>
    %cst = arith.constant dense<0.000000e+00> : vector<8x128xf32>
    %2 = tpu.matmul %1, %0, %cst {dimension_numbers = #tpu.dot_dimension_numbers<[1], [1], [0], [0], [0, 0, 1, 0], [], []>} : vector<8x1024xf32>, vector<128x1024xf32>, vector<8x128xf32> -> vector<8x128xf32>
    %cst_3 = arith.constant dense<0xFF800000> : vector<8xf32>
    %3 = vector.multi_reduction <maximumf>, %2, %cst_3 [1] : vector<8x128xf32> to vector<8xf32>
    %4 = vector.shape_cast %3 : vector<8xf32> to vector<8x1xf32>
    %5 = vector.broadcast %4 : vector<8x1xf32> to vector<8x128xf32>
    %6 = arith.subf %2, %5 : vector<8x128xf32>
    %7 = math.exp %6 : vector<8x128xf32>
    %cst_4 = arith.constant dense<0.000000e+00> : vector<8xf32>
    %8 = vector.multi_reduction <add>, %7, %cst_4 [1] : vector<8x128xf32> to vector<8xf32>
    %9 = vector.shape_cast %8 : vector<8xf32> to vector<8x1xf32>
    %10 = tpu.reciprocal %9 : vector<8x1xf32> -> vector<8x1xf32>
    %11 = vector.broadcast %10 : vector<8x1xf32> to vector<8x128xf32>
    %12 = arith.mulf %7, %11 : vector<8x128xf32>
    %cst_5 = arith.constant 5.000000e-02 : f32
    %13 = vector.broadcast %cst_5 : f32 to vector<8x128xf32>
    %14 = arith.subf %12, %13 : vector<8x128xf32>
    %cst_6 = arith.constant 0.000000e+00 : f32
    %15 = vector.broadcast %cst_6 : f32 to vector<8x128xf32>
    %16 = arith.maximumf %14, %15 : vector<8x128xf32>
    %17 = arith.mulf %16, %12 : vector<8x128xf32>
    %18 = math.absf %14 : vector<8x128xf32>
    %cst_7 = arith.constant 9.99999996E-13 : f32
    %19 = vector.broadcast %cst_7 : f32 to vector<8x128xf32>
    %20 = arith.addf %18, %19 : vector<8x128xf32>
    %21 = tpu.reciprocal %20 : vector<8x128xf32> -> vector<8x128xf32>
    %22 = arith.mulf %17, %21 : vector<8x128xf32>
    %cst_8 = arith.constant dense<0.000000e+00> : vector<8xf32>
    %23 = vector.multi_reduction <add>, %22, %cst_8 [1] : vector<8x128xf32> to vector<8xf32>
    %24 = vector.shape_cast %23 : vector<8xf32> to vector<8x1xf32>
    %cst_9 = arith.constant 9.99999996E-13 : f32
    %25 = vector.broadcast %cst_9 : f32 to vector<8x1xf32>
    %26 = arith.maximumf %24, %25 : vector<8x1xf32>
    %27 = tpu.reciprocal %26 : vector<8x1xf32> -> vector<8x1xf32>
    %28 = vector.broadcast %27 : vector<8x1xf32> to vector<8x128xf32>
    %29 = arith.mulf %22, %28 : vector<8x128xf32>
    %cst_10 = arith.constant dense<0.000000e+00> : vector<8x1024xf32>
    %30 = tpu.matmul %29, %0, %cst_10 {dimension_numbers = #tpu.dot_dimension_numbers<[1], [0], [0], [1], [0, 0, 1, 1], [], []>} : vector<8x128xf32>, vector<128x1024xf32>, vector<8x1024xf32> -> vector<8x1024xf32>
    %c0_11 = arith.constant 0 : index
    %c0_12 = arith.constant 0 : index
    %31 = vector.load %arg3[%c0_11, %c0_12] : memref<8x1024xf32, #tpu.memory_space<vmem>>, vector<8x1024xf32>
    tpu.vector_store %arg3[%c0_11, %c0_12], %30 {strides = array<i32>} : memref<8x1024xf32, #tpu.memory_space<vmem>>, vector<8x1024xf32>,
    %c0_13 = arith.constant 0 : index
    %c0_14 = arith.constant 0 : index
    %32 = vector.load %arg4[%c0_13, %c0_14] : memref<8x128xf32, #tpu.memory_space<vmem>>, vector<8x128xf32>
    tpu.vector_store %arg4[%c0_13, %c0_14], %29 {strides = array<i32>} : memref<8x128xf32, #tpu.memory_space<vmem>>, vector<8x128xf32>,
    return
  }
  func.func @transform_0(%arg0: i32) -> (i32, i32) {
    %c0_i32 = arith.constant 0 : i32
    %c0_i32_0 = arith.constant 0 : i32
    return %arg0, %c0_i32 : i32, i32
  }
  func.func @transform_1(%arg0: i32) -> (i32, i32) {
    %c0_i32 = arith.constant 0 : i32
    %c0_i32_0 = arith.constant 0 : i32
    %c0_i32_1 = arith.constant 0 : i32
    return %c0_i32, %c0_i32_0 : i32, i32
  }
  func.func @transform_2(%arg0: i32) -> (i32, i32) {
    %c0_i32 = arith.constant 0 : i32
    %c0_i32_0 = arith.constant 0 : i32
    return %arg0, %c0_i32 : i32, i32
  }
  func.func @transform_3(%arg0: i32) -> (i32, i32) {
    %c0_i32 = arith.constant 0 : i32
    %c0_i32_0 = arith.constant 0 : i32
    return %arg0, %c0_i32 : i32, i32
  }
}

</mosaic_0001>

<bundles_post_ra>
// kernel: tpu_custom_call.1
= control target key start
LH: loop header
LB: loop body
LE: loop exit
PB: predicated region body
PF: predicated region fallthrough
CT: control target
= control target key end

     0   :  { %9 = vsyncpa [#allocation3], 0  ;;  %s1727_s0 = inlined_call_operand.hbm [shape: f32[2,1024], index: 0, kind: input, shape index: {}]   ;;  %s1728_s1 = inlined_call_operand.hbm [shape: f32[128,1024], index: 1, kind: input, shape index: {}]   ;;  %s1729_s2 = inlined_call_operand.hbm [shape: f32[2,1024], index: 2, kind: output, shape index: {0}]   ;;  %s1730_s3 = inlined_call_operand.hbm [shape: f32[2,128], index: 3, kind: output, shape index: {1}]  }
   0x1   :  { %10 = vsyncpa [#allocation6], 0 }
   0x2   :  { %11 = vsyncpa [#allocation4], 0 }
   0x3   :  { %12 = vsyncpa [#allocation9], 0 }
   0x4   :  { %17 = vsyncadd [#allocation3], 768  ;;  %s1104_s12 = smov [#allocation2]  }
   0x5   :  { %s18_s13 = sshll.u32 %s1104_s12, 4  ;;  %s19_s13 = int_to_ptr.vmem [resolvable:$true] %s18_s13 }
   0x6   :  { %s1024_s14 = scalar_lea.vmem %s19_s13, 256  ;;  %s1028_s15 = scalar_lea.vmem %s19_s13, 1024 }
   0x7   :  { %p1025_p0 = scmp.ne.s32.totalorder %s19_s13, %s1024_s14  ;;  %p1029_p1 = scmp.lt.s32.totalorder %s19_s13, %s19_s13 }
   0x8   :  { %p1030_p2 = scmp.lt.s32.totalorder %s1028_s15, %s1024_s14 }
   0xa   :  { %p1031_p3 = por %p1030_p2, %p1029_p1 }
   0xc   :  { %p1032_p4 = pnand %p1031_p3, %p1025_p0 }
   0xe   :  { %1035 = shalt.err (!%p1032_p4)
}
   0xf   :  { %s1105_s16 = smov 256   ;;  %s1106_s17 = smov 16  }
  0x10   :  { %24 = dma.hbm_to_vmem [thread:$0]  %s1727_s0, 256, %s19_s13, [#allocation3], %s1105_s16, %s1105_s16, %s1106_s17  }
  0x11   :  { %s1107_s20 = smov [#allocation5]  }
  0x12   :  { %s30_s21 = sshll.u32 %s1107_s20, 4  ;;  %s31_s21 = int_to_ptr.vmem [resolvable:$true] %s30_s21 }
  0x13   :  { %s1044_s22 = scalar_lea.vmem %s31_s21, 16384  ;;  %p1049_p6 = scmp.lt.s32.totalorder %s31_s21, %s31_s21 }
  0x14   :  { %p1045_p5 = scmp.ne.s32.totalorder %s31_s21, %s1044_s22  ;;  %p1050_p7 = scmp.lt.s32.totalorder %s1044_s22, %s1044_s22 }
  0x16   :  { %p1051_p8 = por %p1050_p7, %p1049_p6 }
  0x18   :  { %p1052_p9 = pnand %p1051_p8, %p1045_p5 }
  0x1a   :  { %1055 = shalt.err (!%p1052_p9)
}
  0x1b   :  { %s1108_s23 = smov 1024   ;;  %s1109_s24 = smov 64  }
  0x1c   :  { %36 = dma.hbm_to_vmem [thread:$0]  %s1728_s1, 16384, %s31_s21, [#allocation6], %s1108_s23, %s1108_s23, %s1109_s24  }
  0x1d   :  { %1096 = dma.done.wait [#allocation3], 1024  }
  0x1e   :  { %1097 = vsyncadd [#allocation3], 4294966272 }
  0x1f   :  { %1098 = dma.done.wait [#allocation6], 16384  }
  0x20   :  { %1099 = vsyncadd [#allocation6], 4294950912  ;;  %v1145_v0 = vld [vmem:[#allocation5 + $0x3c8] sm:$0xff]  ;;  %v1147_v1 = vld [vmem:[#allocation5 + $0x3d8] sm:$0xff]  ;;  %v1110_v18 = vmov 1983009808   ;;  %v194_v20 = vlaneseq }
  0x21   :  { %v1149_v2 = vld [vmem:[#allocation5 + $0x3c0] sm:$0xff]  ;;  %267 = vmatprep.subr.mxu0 %v1145_v0  ;;  %337 = vmatprep.subr.mxu1 %v1147_v1  ;;  %v1153_v3 = vld [vmem:[#allocation5 + $0x3d0] sm:$0xff]  ;;  %v1155_v4 = vld [vmem:[#allocation5 + $0x388] sm:$0xff]  ;;  %v192_v19 = vunpack.c.l.s4 %v1110_v18 }
  0x22   :  { %v1157_v5 = vld [vmem:[#allocation5 + $0x398] sm:$0xff]  ;;  %268 = vmatpush1.xpose.msra.mxu0 %v1149_v2  ;;  %338 = vmatpush1.xpose.msra.mxu1 %v1153_v3  ;;  %v1163_v6 = vld [vmem:[#allocation5 + $0x380] sm:$0xff]  ;;  %v1165_v7 = vld [vmem:[#allocation5 + $0x390] sm:$0xff]  ;;  %v195_v26 = vshrl.u32 %v194_v20, 7 }
  0x23   :  { %269 = vmatprep.subr.mxu0 %v1155_v4  ;;  %339 = vmatprep.subr.mxu1 %v1157_v5  ;;  %v1167_v8 = vld [vmem:[#allocation5 + $0x348] sm:$0xff]  ;;  %v1169_v9 = vld [vmem:[#allocation5 + $0x358] sm:$0xff]  ;;  %v1175_v10 = vld [vmem:[#allocation5 + $0x340] sm:$0xff]  ;;  %v193_v25 = vunpack.c.0.s8 %v192_v19 }
  0x24   :  { %v1177_v11 = vld [vmem:[#allocation5 + $0x350] sm:$0xff]  ;;  %v1179_v12 = vld [vmem:[#allocation5 + $0x308] sm:$0xff]  ;;  %v1181_v13 = vld [vmem:[#allocation5 + $0x318] sm:$0xff] }
  0x25   :  { %v1187_v14 = vld [vmem:[#allocation5 + $0x300] sm:$0xff]  ;;  %v1189_v15 = vld [vmem:[#allocation5 + $0x310] sm:$0xff]  ;;  %v1191_v16 = vld [vmem:[#allocation5 + $0x2c8] sm:$0xff]  ;;  %v1219_v31 = vsub.s32 %v193_v25, %v195_v26 }
  0x26   :  { %270 = vmatpush1.xpose.msra.mxu0 %v1163_v6  ;;  %340 = vmatpush1.xpose.msra.mxu1 %v1165_v7  ;;  %v1193_v17 = vld [vmem:[#allocation5 + $0x2d8] sm:$0xff]  ;;  %v1199_v21 = vld [vmem:[#allocation5 + $0x2c0] sm:$0xff]  ;;  %v1201_v22 = vld [vmem:[#allocation5 + $0x2d0] sm:$0xff] }
  0x27   :  { %271 = vmatprep.subr.mxu0 %v1167_v8  ;;  %341 = vmatprep.subr.mxu1 %v1169_v9  ;;  %v1203_v23 = vld [vmem:[#allocation5 + $0x288] sm:$0xff]  ;;  %v1205_v24 = vld [vmem:[#allocation5 + $0x298] sm:$0xff]  ;;  %v1211_v27 = vld [vmem:[#allocation5 + $0x280] sm:$0xff]  ;;  %1803 = vst [vmem:[#allocation14_spill] sm:$0xff] %v1219_v31 }
  0x28   :  { %v1213_v28 = vld [vmem:[#allocation5 + $0x290] sm:$0xff]  ;;  %v1215_v29 = vld [vmem:[#allocation5 + $0x248] sm:$0xff]  ;;  %v1217_v30 = vld [vmem:[#allocation5 + $0x258] sm:$0xff] }
  0x29   :  { %v1221_v32 = vld [vmem:[#allocation5 + $0x240] sm:$0xff]  ;;  %v1223_v33 = vld [vmem:[#allocation5 + $0x250] sm:$0xff]  ;;  %v1229_v38 = vld [vmem:[#allocation5 + $0x208] sm:$0xff] }
  0x2a   :  { %272 = vmatpush1.xpose.msra.mxu0 %v1175_v10  ;;  %342 = vmatpush1.xpose.msra.mxu1 %v1177_v11  ;;  %v996_v34 = vld [vmem:[#allocation2] ss:$16 sps:$4 sm:$0xff]   ;;  %v1000_v36 = vld [vmem:[#allocation2 + $0x4] ss:$16 sps:$4 sm:$0xff]   ;;  %v1231_v39 = vld [vmem:[#allocation5 + $0x218] sm:$0xff] }
  0x2b   :  { %273 = vmatprep.subr.mxu0 %v1179_v12  ;;  %343 = vmatprep.subr.mxu1 %v1181_v13  ;;  %v998_v35 = vld [vmem:[#allocation2 + $0x20] ss:$16 sps:$4 sm:$0xff]   ;;  %v1001_v37 = vld [vmem:[#allocation2 + $0x24] ss:$16 sps:$4 sm:$0xff]   ;;  %v1234_v40 = vrot.slane %v996_v34, %v1219_v31  ;;  %v1240_v42 = vrot.slane %v1000_v36, %v1219_v31  ;;  %v1257_v48 = vld [vmem:[#allocation5 + $0x1c8] sm:$0xff] }
  0x2c   :  { %v1237_v41 = vrot.slane %v998_v35, %v1219_v31  ;;  %v1243_v43 = vrot.slane %v1001_v37, %v1219_v31  ;;  %v1249_v44 = vld [vmem:[#allocation5 + $0x200] sm:$0xff]  ;;  %v1251_v45 = vld [vmem:[#allocation5 + $0x210] sm:$0xff]  ;;  %v1259_v49 = vld [vmem:[#allocation5 + $0x1d8] sm:$0xff] }
  0x2d   :  { %v1265_v50 = vld [vmem:[#allocation5 + $0x1c0] sm:$0xff]  ;;  %v1267_v51 = vld [vmem:[#allocation5 + $0x1d0] sm:$0xff]  ;;  %v1269_v52 = vld [vmem:[#allocation5 + $0x188] sm:$0xff] }
  0x2e   :  { %274 = vmatpush1.xpose.msra.mxu0 %v1187_v14  ;;  %344 = vmatpush1.xpose.msra.mxu1 %v1189_v15  ;;  %v220_v46 = vcombine.high %v1234_v40, %v1237_v41  ;;  %v222_v47 = vcombine.high %v1240_v42, %v1243_v43  ;;  %v1271_v53 = vld [vmem:[#allocation5 + $0x198] sm:$0xff]  ;;  %v1277_v54 = vld [vmem:[#allocation5 + $0x180] sm:$0xff]  ;;  %v1279_v55 = vld [vmem:[#allocation5 + $0x190] sm:$0xff] }
  0x2f   :  { %275 = vmatprep.subr.mxu0 %v1191_v16  ;;  %345 = vmatprep.subr.mxu1 %v1193_v17  ;;  %v1281_v56 = vld [vmem:[#allocation5 + $0x148] sm:$0xff]  ;;  %v1283_v57 = vld [vmem:[#allocation5 + $0x158] sm:$0xff]  ;;  %v1289_v58 = vld [vmem:[#allocation5 + $0x140] sm:$0xff] }
  0x30   :  { %331 = vmatprep.mubr.f32.mxu0 %v220_v46  ;;  %401 = vmatprep.mubr.f32.mxu1 %v222_v47  ;;  %v1291_v59 = vld [vmem:[#allocation5 + $0x150] sm:$0xff]  ;;  %v1293_v60 = vld [vmem:[#allocation5 + $0x108] sm:$0xff]  ;;  %v1295_v61 = vld [vmem:[#allocation5 + $0x118] sm:$0xff] }
  0x31   :  { %1804 = vst [vmem:[#allocation15_spill] sm:$0xff] %v1295_v61  ;;  %v1301_v62 = vld [vmem:[#allocation5 + $0x100] sm:$0xff]  ;;  %v1303_v63 = vld [vmem:[#allocation5 + $0x110] sm:$0xff]  ;;  %v1305_v18 = vld [vmem:[#allocation5 + $0xc8] sm:$0xff] }
  0x32   :  { %276 = vmatpush1.xpose.msra.mxu0 %v1199_v21  ;;  %346 = vmatpush1.xpose.msra.mxu1 %v1201_v22  ;;  %1805 = vst [vmem:[#allocation16_spill] sm:$0xff] %v1301_v62  ;;  %1806 = vst [vmem:[#allocation17_spill] sm:$0xff] %v1303_v63  ;;  %v1307_v19 = vld [vmem:[#allocation5 + $0xd8] sm:$0xff]  ;;  %v1313_v20 = vld [vmem:[#allocation5 + $0xc0] sm:$0xff] }
  0x33   :  { %277 = vmatprep.subr.mxu0 %v1203_v23  ;;  %347 = vmatprep.subr.mxu1 %v1205_v24  ;;  %1807 = vst [vmem:[#allocation18_spill] sm:$0xff] %v1305_v18  ;;  %1808 = vst [vmem:[#allocation19_spill] sm:$0xff] %v1307_v19  ;;  %v1315_v25 = vld [vmem:[#allocation5 + $0xd0] sm:$0xff]  ;;  %v1317_v26 = vld [vmem:[#allocation5 + $0x88] sm:$0xff] }
  0x34   :  { %1809 = vst [vmem:[#allocation20_spill] sm:$0xff] %v1313_v20  ;;  %1810 = vst [vmem:[#allocation21_spill] sm:$0xff] %v1315_v25  ;;  %v1319_v34 = vld [vmem:[#allocation5 + $0x98] sm:$0xff]  ;;  %v1325_v35 = vld [vmem:[#allocation5 + $0x80] sm:$0xff] }
  0x35   :  { %1811 = vst [vmem:[#allocation22_spill] sm:$0xff] %v1317_v26  ;;  %1812 = vst [vmem:[#allocation23_spill] sm:$0xff] %v1319_v34  ;;  %v1327_v36 = vld [vmem:[#allocation5 + $0x90] sm:$0xff]  ;;  %v1329_v37 = vld [vmem:[#allocation5 + $0x48] sm:$0xff] }
  0x36   :  { %278 = vmatpush1.xpose.msra.mxu0 %v1211_v27  ;;  %348 = vmatpush1.xpose.msra.mxu1 %v1213_v28  ;;  %1813 = vst [vmem:[#allocation24_spill] sm:$0xff] %v1325_v35  ;;  %1814 = vst [vmem:[#allocation25_spill] sm:$0xff] %v1327_v36  ;;  %v1331_v46 = vld [vmem:[#allocation5 + $0x58] sm:$0xff]  ;;  %v1335_v47 = vld [vmem:[#allocation5 + $0x40] sm:$0xff] }
  0x37   :  { %279 = vmatprep.subr.mxu0 %v1215_v29  ;;  %349 = vmatprep.subr.mxu1 %v1217_v30  ;;  %1815 = vst [vmem:[#allocation26_spill] sm:$0xff] %v1329_v37  ;;  %1816 = vst [vmem:[#allocation27_spill] sm:$0xff] %v1331_v46 }
  0x38   :  { %1817 = vst [vmem:[#allocation28_spill] sm:$0xff] %v1335_v47 }
  0x3a   :  { %280 = vmatpush1.xpose.msra.mxu0 %v1221_v32  ;;  %350 = vmatpush1.xpose.msra.mxu1 %v1223_v33 }
  0x3b   :  { %281 = vmatprep.subr.mxu0 %v1229_v38  ;;  %351 = vmatprep.subr.mxu1 %v1231_v39 }
  0x3e   :  { %282 = vmatpush1.xpose.msra.mxu0 %v1249_v44  ;;  %352 = vmatpush1.xpose.msra.mxu1 %v1251_v45 }
  0x3f   :  { %283 = vmatprep.subr.mxu0 %v1257_v48  ;;  %353 = vmatprep.subr.mxu1 %v1259_v49 }
  0x42   :  { %284 = vmatpush1.xpose.msra.mxu0 %v1265_v50  ;;  %354 = vmatpush1.xpose.msra.mxu1 %v1267_v51 }
  0x43   :  { %285 = vmatprep.subr.mxu0 %v1269_v52  ;;  %355 = vmatprep.subr.mxu1 %v1271_v53 }
  0x46   :  { %286 = vmatpush1.xpose.msra.mxu0 %v1277_v54  ;;  %356 = vmatpush1.xpose.msra.mxu1 %v1279_v55 }
  0x47   :  { %287 = vmatprep.subr.mxu0 %v1281_v56  ;;  %357 = vmatprep.subr.mxu1 %v1283_v57 }
  0x4a   :  { %288 = vmatpush1.xpose.msra.mxu0 %v1289_v58  ;;  %358 = vmatpush1.xpose.msra.mxu1 %v1291_v59 }
  0x4b   :  { %289 = vmatprep.subr.mxu0 %v1293_v60  ;;  %359 = vmatprep.subr.mxu1 %v1295_v61 }
  0x4e   :  { %290 = vmatpush1.xpose.msra.mxu0 %v1301_v62  ;;  %360 = vmatpush1.xpose.msra.mxu1 %v1303_v63  ;;  %v1007_v63 = vld [vmem:[#allocation2 + $0x2c] ss:$16 sps:$4 sm:$0xff]  }
  0x4f   :  { %291 = vmatprep.subr.mxu0 %v1305_v18  ;;  %361 = vmatprep.subr.mxu1 %v1307_v19  ;;  %v1004_v19 = vld [vmem:[#allocation2 + $0x28] ss:$16 sps:$4 sm:$0xff]   ;;  %v1006_v18 = vld [vmem:[#allocation2 + $0xc] ss:$16 sps:$4 sm:$0xff]  }
  0x50   :  { %v1361_v61 = vrot.slane %v1004_v19, %v1219_v31  ;;  %v1377_v19 = vld [vmem:[#allocation5 + $0x3e0] sm:$0xff] }
  0x52   :  { %292 = vmatpush1.xpose.msra.mxu0 %v1313_v20  ;;  %362 = vmatpush1.xpose.msra.mxu1 %v1315_v25  ;;  %v1337_v20 = vld [vmem:[#allocation5 + $0x50] sm:$0xff]  ;;  %v1002_v25 = vld [vmem:[#allocation2 + $0x8] ss:$16 sps:$4 sm:$0xff]  }
  0x53   :  { %293 = vmatprep.subr.mxu0 %v1317_v26  ;;  %363 = vmatprep.subr.mxu1 %v1319_v34  ;;  %1818 = vst [vmem:[#allocation29_spill] sm:$0xff] %v1337_v20  ;;  %v1341_v34 = vld [vmem:[#allocation5 + $0x8] sm:$0xff]  ;;  %v1343_v26 = vld [vmem:[#allocation5 + $0x18] sm:$0xff]  ;;  %v1358_v62 = vrot.slane %v1002_v25, %v1219_v31 }
  0x54   :  { %1819 = vst [vmem:[#allocation30_spill] sm:$0xff] %v1341_v34  ;;  %1820 = vst [vmem:[#allocation31_spill] sm:$0xff] %v1343_v26  ;;  %v1383_v25 = vld [vmem:[#allocation5 + $0x3b8] sm:$0xff] }
  0x55   :  { %1823 = vst [vmem:[#allocation34_spill] sm:$0xff] %v1383_v25 }
  0x56   :  { %294 = vmatpush1.xpose.msra.mxu0 %v1325_v35  ;;  %364 = vmatpush1.xpose.msra.mxu1 %v1327_v36  ;;  %v1349_v36 = vld [vmem:[#allocation5] sm:$0xff]  ;;  %v1355_v35 = vld [vmem:[#allocation5 + $0x3f8] sm:$0xff] }
  0x57   :  { %295 = vmatprep.subr.mxu0 %v1329_v37  ;;  %365 = vmatprep.subr.mxu1 %v1331_v46  ;;  %v1351_v37 = vld [vmem:[#allocation5 + $0x10] sm:$0xff]  ;;  %v1353_v46 = vld [vmem:[#allocation5 + $0x3e8] sm:$0xff]  ;;  %1821 = vst [vmem:[#allocation32_spill] sm:$0xff] %v1355_v35 }
  0x5a   :  { %296 = vmatpush1.xpose.msra.mxu0 %v1335_v47  ;;  %366 = vmatpush1.xpose.msra.mxu1 %v1337_v20  ;;  %v1364_v20 = vrot.slane %v1006_v18, %v1219_v31  ;;  %v221_v47 = vcombine.low %v1240_v42, %v1243_v43  ;;  %v1379_v18 = vld [vmem:[#allocation5 + $0x3f0] sm:$0xff]  ;;  %v1393_v42 = vld [vmem:[#allocation5 + $0x3a0] sm:$0xff] }
  0x5b   :  { %297 = vmatprep.subr.mxu0 %v1341_v34  ;;  %367 = vmatprep.subr.mxu1 %v1343_v26  ;;  %v1367_v34 = vrot.slane %v1007_v63, %v1219_v31  ;;  %v219_v26 = vcombine.low %v1234_v40, %v1237_v41  ;;  %v1381_v63 = vld [vmem:[#allocation5 + $0x3a8] sm:$0xff]  ;;  %v256_v40 = vcombine.high %v1358_v62, %v1361_v61  ;;  %v1395_v43 = vld [vmem:[#allocation5 + $0x3b0] sm:$0xff] }
  0x5c   :  { %1822 = vst [vmem:[#allocation33_spill] sm:$0xff] %v1381_v63  ;;  %v1397_v31 = vld [vmem:[#allocation5 + $0x368] sm:$0xff] }
  0x5d   :  { %v258_v41 = vcombine.high %v1364_v20, %v1367_v34  ;;  %1824 = vst [vmem:[#allocation35_spill] sm:$0xff] %v1397_v31 }
  0x5e   :  { %298 = vmatpush1.xpose.msra.mxu0 %v1349_v36  ;;  %368 = vmatpush1.xpose.msra.mxu1 %v1351_v37 }
  0x5f   :  { %407 = vmatprep.subr.mxu0 %v1353_v46  ;;  %477 = vmatprep.subr.mxu1 %v1355_v35  ;;  %v1399_v35 = vld [vmem:[#allocation5 + $0x378] sm:$0xff] }
  0x60   :  { %1825 = vst [vmem:[#allocation36_spill] sm:$0xff] %v1399_v35 }
  0x61   :  { %332 = vmatmul.mubr.f32.vlgmr.msra.gmra.mxu0 %v219_v26  ;;  %402 = vmatmul.mubr.f32.vlgmr.msra.gmra.mxu1 %v221_v47  ;;  %v1405_v26 = vld [vmem:[#allocation5 + $0x360] sm:$0xff]  ;;  %v1407_v47 = vld [vmem:[#allocation5 + $0x370] sm:$0xff] }
  0x62   :  { %408 = vmatpush1.xpose.msra.mxu0 %v1377_v19  ;;  %478 = vmatpush1.xpose.msra.mxu1 %v1379_v18  ;;  %1826 = vst [vmem:[#allocation37_spill] sm:$0xff] %v1405_v26  ;;  %1827 = vst [vmem:[#allocation38_spill] sm:$0xff] %v1407_v47 }
  0x63   :  { %409 = vmatprep.subr.mxu0 %v1381_v63  ;;  %479 = vmatprep.subr.mxu1 %v1383_v25  ;;  %v1409_v25 = vld [vmem:[#allocation5 + $0x328] sm:$0xff]  ;;  %v1411_v63 = vld [vmem:[#allocation5 + $0x338] sm:$0xff] }
  0x64   :  { %471 = vmatprep.mubr.f32.mxu0 %v256_v40  ;;  %541 = vmatprep.mubr.f32.mxu1 %v258_v41  ;;  %1828 = vst [vmem:[#allocation39_spill] sm:$0xff] %v1409_v25  ;;  %1829 = vst [vmem:[#allocation40_spill] sm:$0xff] %v1411_v63  ;;  %v1417_v40 = vld [vmem:[#allocation5 + $0x320] sm:$0xff]  ;;  %v1419_v41 = vld [vmem:[#allocation5 + $0x330] sm:$0xff] }
  0x65   :  { %1830 = vst [vmem:[#allocation41_spill] sm:$0xff] %v1417_v40  ;;  %1831 = vst [vmem:[#allocation42_spill] sm:$0xff] %v1419_v41 }
  0x66   :  { %410 = vmatpush1.xpose.msra.mxu0 %v1393_v42  ;;  %480 = vmatpush1.xpose.msra.mxu1 %v1395_v43 }
  0x67   :  { %411 = vmatprep.subr.mxu0 %v1397_v31  ;;  %481 = vmatprep.subr.mxu1 %v1399_v35  ;;  %v1421_v35 = vld [vmem:[#allocation5 + $0x2e8] sm:$0xff]  ;;  %v1423_v31 = vld [vmem:[#allocation5 + $0x2f8] sm:$0xff] }
  0x68   :  { %1832 = vst [vmem:[#allocation43_spill] sm:$0xff] %v1421_v35  ;;  %1833 = vst [vmem:[#allocation44_spill] sm:$0xff] %v1423_v31 }
  0x6a   :  { %412 = vmatpush1.xpose.msra.mxu0 %v1405_v26  ;;  %482 = vmatpush1.xpose.msra.mxu1 %v1407_v47  ;;  %v1429_v47 = vld [vmem:[#allocation5 + $0x2e0] sm:$0xff]  ;;  %v1435_v26 = vld [vmem:[#allocation5 + $0x2b8] sm:$0xff] }
  0x6b   :  { %413 = vmatprep.subr.mxu0 %v1409_v25  ;;  %483 = vmatprep.subr.mxu1 %v1411_v63  ;;  %1834 = vst [vmem:[#allocation45_spill] sm:$0xff] %v1429_v47  ;;  %v1431_v25 = vld [vmem:[#allocation5 + $0x2f0] sm:$0xff]  ;;  %v1433_v63 = vld [vmem:[#allocation5 + $0x2a8] sm:$0xff]  ;;  %1837 = vst [vmem:[#allocation48_spill] sm:$0xff] %v1435_v26 }
  0x6c   :  { %1835 = vst [vmem:[#allocation46_spill] sm:$0xff] %v1431_v25  ;;  %1836 = vst [vmem:[#allocation47_spill] sm:$0xff] %v1433_v63 }
  0x6e   :  { %414 = vmatpush1.xpose.msra.mxu0 %v1417_v40  ;;  %484 = vmatpush1.xpose.msra.mxu1 %v1419_v41  ;;  %v1441_v41 = vld [vmem:[#allocation5 + $0x2a0] sm:$0xff]  ;;  %v1447_v40 = vld [vmem:[#allocation5 + $0x278] sm:$0xff] }
  0x6f   :  { %415 = vmatprep.subr.mxu0 %v1421_v35  ;;  %485 = vmatprep.subr.mxu1 %v1423_v31  ;;  %1838 = vst [vmem:[#allocation49_spill] sm:$0xff] %v1441_v41  ;;  %v1443_v35 = vld [vmem:[#allocation5 + $0x2b0] sm:$0xff]  ;;  %v1445_v31 = vld [vmem:[#allocation5 + $0x268] sm:$0xff]  ;;  %1841 = vst [vmem:[#allocation52_spill] sm:$0xff] %v1447_v40 }
  0x70   :  { %1839 = vst [vmem:[#allocation50_spill] sm:$0xff] %v1443_v35  ;;  %1840 = vst [vmem:[#allocation51_spill] sm:$0xff] %v1445_v31 }
  0x72   :  { %416 = vmatpush1.xpose.msra.mxu0 %v1429_v47  ;;  %486 = vmatpush1.xpose.msra.mxu1 %v1431_v25  ;;  %v1453_v25 = vld [vmem:[#allocation5 + $0x260] sm:$0xff]  ;;  %v1459_v47 = vld [vmem:[#allocation5 + $0x238] sm:$0xff] }
  0x73   :  { %417 = vmatprep.subr.mxu0 %v1433_v63  ;;  %487 = vmatprep.subr.mxu1 %v1435_v26  ;;  %1842 = vst [vmem:[#allocation53_spill] sm:$0xff] %v1453_v25  ;;  %v1455_v63 = vld [vmem:[#allocation5 + $0x270] sm:$0xff]  ;;  %v1457_v26 = vld [vmem:[#allocation5 + $0x228] sm:$0xff]  ;;  %1845 = vst [vmem:[#allocation56_spill] sm:$0xff] %v1459_v47 }
  0x74   :  { %1843 = vst [vmem:[#allocation54_spill] sm:$0xff] %v1455_v63  ;;  %1844 = vst [vmem:[#allocation55_spill] sm:$0xff] %v1457_v26 }
  0x76   :  { %418 = vmatpush1.xpose.msra.mxu0 %v1441_v41  ;;  %488 = vmatpush1.xpose.msra.mxu1 %v1443_v35  ;;  %v1465_v35 = vld [vmem:[#allocation5 + $0x220] sm:$0xff]  ;;  %v1471_v41 = vld [vmem:[#allocation5 + $0x1f8] sm:$0xff] }
  0x77   :  { %419 = vmatprep.subr.mxu0 %v1445_v31  ;;  %489 = vmatprep.subr.mxu1 %v1447_v40  ;;  %1846 = vst [vmem:[#allocation57_spill] sm:$0xff] %v1465_v35  ;;  %v1467_v31 = vld [vmem:[#allocation5 + $0x230] sm:$0xff]  ;;  %v1469_v40 = vld [vmem:[#allocation5 + $0x1e8] sm:$0xff]  ;;  %1849 = vst [vmem:[#allocation60_spill] sm:$0xff] %v1471_v41 }
  0x78   :  { %1847 = vst [vmem:[#allocation58_spill] sm:$0xff] %v1467_v31  ;;  %1848 = vst [vmem:[#allocation59_spill] sm:$0xff] %v1469_v40 }
  0x7a   :  { %420 = vmatpush1.xpose.msra.mxu0 %v1453_v25  ;;  %490 = vmatpush1.xpose.msra.mxu1 %v1455_v63  ;;  %v1477_v63 = vld [vmem:[#allocation5 + $0x1e0] sm:$0xff]  ;;  %v1483_v25 = vld [vmem:[#allocation5 + $0x1b8] sm:$0xff] }
  0x7b   :  { %421 = vmatprep.subr.mxu0 %v1457_v26  ;;  %491 = vmatprep.subr.mxu1 %v1459_v47  ;;  %1850 = vst [vmem:[#allocation61_spill] sm:$0xff] %v1477_v63  ;;  %v1479_v26 = vld [vmem:[#allocation5 + $0x1f0] sm:$0xff]  ;;  %v1481_v47 = vld [vmem:[#allocation5 + $0x1a8] sm:$0xff]  ;;  %1853 = vst [vmem:[#allocation64_spill] sm:$0xff] %v1483_v25 }
  0x7c   :  { %1851 = vst [vmem:[#allocation62_spill] sm:$0xff] %v1479_v26  ;;  %1852 = vst [vmem:[#allocation63_spill] sm:$0xff] %v1481_v47 }
  0x7e   :  { %422 = vmatpush1.xpose.msra.mxu0 %v1465_v35  ;;  %492 = vmatpush1.xpose.msra.mxu1 %v1467_v31  ;;  %v1489_v31 = vld [vmem:[#allocation5 + $0x1a0] sm:$0xff]  ;;  %v1495_v35 = vld [vmem:[#allocation5 + $0x178] sm:$0xff] }
  0x7f   :  { %423 = vmatprep.subr.mxu0 %v1469_v40  ;;  %493 = vmatprep.subr.mxu1 %v1471_v41  ;;  %1854 = vst [vmem:[#allocation65_spill] sm:$0xff] %v1489_v31  ;;  %v1491_v40 = vld [vmem:[#allocation5 + $0x1b0] sm:$0xff]  ;;  %v1493_v41 = vld [vmem:[#allocation5 + $0x168] sm:$0xff]  ;;  %1857 = vst [vmem:[#allocation68_spill] sm:$0xff] %v1495_v35 }
  0x80   :  { %1855 = vst [vmem:[#allocation66_spill] sm:$0xff] %v1491_v40  ;;  %1856 = vst [vmem:[#allocation67_spill] sm:$0xff] %v1493_v41 }
  0x82   :  { %424 = vmatpush1.xpose.msra.mxu0 %v1477_v63  ;;  %494 = vmatpush1.xpose.msra.mxu1 %v1479_v26  ;;  %v1501_v26 = vld [vmem:[#allocation5 + $0x160] sm:$0xff]  ;;  %v1507_v63 = vld [vmem:[#allocation5 + $0x138] sm:$0xff] }
  0x83   :  { %425 = vmatprep.subr.mxu0 %v1481_v47  ;;  %495 = vmatprep.subr.mxu1 %v1483_v25  ;;  %1858 = vst [vmem:[#allocation69_spill] sm:$0xff] %v1501_v26  ;;  %v1503_v47 = vld [vmem:[#allocation5 + $0x170] sm:$0xff]  ;;  %v1505_v25 = vld [vmem:[#allocation5 + $0x128] sm:$0xff]  ;;  %1861 = vst [vmem:[#allocation72_spill] sm:$0xff] %v1507_v63 }
  0x84   :  { %1859 = vst [vmem:[#allocation70_spill] sm:$0xff] %v1503_v47  ;;  %1860 = vst [vmem:[#allocation71_spill] sm:$0xff] %v1505_v25 }
  0x86   :  { %426 = vmatpush1.xpose.msra.mxu0 %v1489_v31  ;;  %496 = vmatpush1.xpose.msra.mxu1 %v1491_v40  ;;  %v1513_v40 = vld [vmem:[#allocation5 + $0x120] sm:$0xff]  ;;  %v1519_v31 = vld [vmem:[#allocation5 + $0xf8] sm:$0xff] }
  0x87   :  { %427 = vmatprep.subr.mxu0 %v1493_v41  ;;  %497 = vmatprep.subr.mxu1 %v1495_v35  ;;  %1862 = vst [vmem:[#allocation73_spill] sm:$0xff] %v1513_v40  ;;  %v1515_v41 = vld [vmem:[#allocation5 + $0x130] sm:$0xff]  ;;  %v1517_v35 = vld [vmem:[#allocation5 + $0xe8] sm:$0xff]  ;;  %1865 = vst [vmem:[#allocation76_spill] sm:$0xff] %v1519_v31 }
  0x88   :  { %1863 = vst [vmem:[#allocation74_spill] sm:$0xff] %v1515_v41  ;;  %1864 = vst [vmem:[#allocation75_spill] sm:$0xff] %v1517_v35 }
  0x8a   :  { %428 = vmatpush1.xpose.msra.mxu0 %v1501_v26  ;;  %498 = vmatpush1.xpose.msra.mxu1 %v1503_v47  ;;  %v1525_v47 = vld [vmem:[#allocation5 + $0xe0] sm:$0xff]  ;;  %v1531_v26 = vld [vmem:[#allocation5 + $0xb8] sm:$0xff] }
  0x8b   :  { %429 = vmatprep.subr.mxu0 %v1505_v25  ;;  %499 = vmatprep.subr.mxu1 %v1507_v63  ;;  %1866 = vst [vmem:[#allocation77_spill] sm:$0xff] %v1525_v47  ;;  %v1527_v25 = vld [vmem:[#allocation5 + $0xf0] sm:$0xff]  ;;  %v1529_v63 = vld [vmem:[#allocation5 + $0xa8] sm:$0xff]  ;;  %1869 = vst [vmem:[#allocation80_spill] sm:$0xff] %v1531_v26 }
  0x8c   :  { %1867 = vst [vmem:[#allocation78_spill] sm:$0xff] %v1527_v25  ;;  %1868 = vst [vmem:[#allocation79_spill] sm:$0xff] %v1529_v63 }
  0x8e   :  { %430 = vmatpush1.xpose.msra.mxu0 %v1513_v40  ;;  %500 = vmatpush1.xpose.msra.mxu1 %v1515_v41  ;;  %v1537_v41 = vld [vmem:[#allocation5 + $0xa0] sm:$0xff]  ;;  %v1543_v40 = vld [vmem:[#allocation5 + $0x78] sm:$0xff] }
  0x8f   :  { %431 = vmatprep.subr.mxu0 %v1517_v35  ;;  %501 = vmatprep.subr.mxu1 %v1519_v31  ;;  %1870 = vst [vmem:[#allocation81_spill] sm:$0xff] %v1537_v41  ;;  %v1539_v35 = vld [vmem:[#allocation5 + $0xb0] sm:$0xff]  ;;  %v1541_v31 = vld [vmem:[#allocation5 + $0x68] sm:$0xff]  ;;  %1873 = vst [vmem:[#allocation84_spill] sm:$0xff] %v1543_v40 }
  0x90   :  { %1871 = vst [vmem:[#allocation82_spill] sm:$0xff] %v1539_v35  ;;  %1872 = vst [vmem:[#allocation83_spill] sm:$0xff] %v1541_v31 }
  0x92   :  { %432 = vmatpush1.xpose.msra.mxu0 %v1525_v47  ;;  %502 = vmatpush1.xpose.msra.mxu1 %v1527_v25  ;;  %v1549_v25 = vld [vmem:[#allocation5 + $0x60] sm:$0xff]  ;;  %v1555_v47 = vld [vmem:[#allocation5 + $0x38] sm:$0xff] }
  0x93   :  { %433 = vmatprep.subr.mxu0 %v1529_v63  ;;  %503 = vmatprep.subr.mxu1 %v1531_v26  ;;  %v1551_v63 = vld [vmem:[#allocation5 + $0x70] sm:$0xff]  ;;  %v1553_v26 = vld [vmem:[#allocation5 + $0x28] sm:$0xff] }
  0x96   :  { %434 = vmatpush1.xpose.msra.mxu0 %v1537_v41  ;;  %504 = vmatpush1.xpose.msra.mxu1 %v1539_v35  ;;  %v1561_v35 = vld [vmem:[#allocation5 + $0x20] sm:$0xff]  ;;  %v257_v41 = vcombine.low %v1364_v20, %v1367_v34 }
  0x97   :  { %435 = vmatprep.subr.mxu0 %v1541_v31  ;;  %505 = vmatprep.subr.mxu1 %v1543_v40  ;;  %v1563_v31 = vld [vmem:[#allocation5 + $0x30] sm:$0xff]  ;;  %v255_v40 = vcombine.low %v1358_v62, %v1361_v61  ;;  %v1892_v34 = vld [vmem:[#allocation33_spill] sm:$0xff] }
  0x9a   :  { %436 = vmatpush1.xpose.msra.mxu0 %v1549_v25  ;;  %506 = vmatpush1.xpose.msra.mxu1 %v1551_v63 }
  0x9b   :  { %437 = vmatprep.subr.mxu0 %v1553_v26  ;;  %507 = vmatprep.subr.mxu1 %v1555_v47 }
  0x9e   :  { %438 = vmatpush1.xpose.msra.mxu0 %v1561_v35  ;;  %508 = vmatpush1.xpose.msra.mxu1 %v1563_v31 }
  0x9f   :  { %568 = vmatprep.subr.mxu0 %v1145_v0  ;;  %639 = vmatprep.subr.mxu1 %v1147_v1  ;;  %v1874_v0 = vld [vmem:[#allocation15_spill] sm:$0xff]  ;;  %v1875_v1 = vld [vmem:[#allocation16_spill] sm:$0xff] }
  0xa1   :  { %472 = vmatmul.mubr.f32.vlgmr.msra.gmra.mxu0 %v255_v40  ;;  %542 = vmatmul.mubr.f32.vlgmr.msra.gmra.mxu1 %v257_v41  ;;  %v1896_v40 = vld [vmem:[#allocation37_spill] sm:$0xff]  ;;  %v1897_v41 = vld [vmem:[#allocation38_spill] sm:$0xff] }
  0xa2   :  { %569 = vmatpush1.msra.mxu0 %v1149_v2  ;;  %640 = vmatpush1.msra.mxu1 %v1153_v3  ;;  %v1876_v2 = vld [vmem:[#allocation17_spill] sm:$0xff]  ;;  %v1877_v3 = vld [vmem:[#allocation18_spill] sm:$0xff] }
  0xa3   :  { %570 = vmatprep.subr.mxu0 %v1155_v4  ;;  %641 = vmatprep.subr.mxu1 %v1157_v5  ;;  %v1878_v4 = vld [vmem:[#allocation19_spill] sm:$0xff]  ;;  %v1879_v5 = vld [vmem:[#allocation20_spill] sm:$0xff] }
  0xa4   :  { %571 = vmatpush1.msra.mxu0 %v1163_v6  ;;  %642 = vmatpush1.msra.mxu1 %v1165_v7  ;;  %v1880_v6 = vld [vmem:[#allocation21_spill] sm:$0xff]  ;;  %v1881_v7 = vld [vmem:[#allocation22_spill] sm:$0xff] }
  0xa5   :  { %572 = vmatprep.subr.mxu0 %v1167_v8  ;;  %643 = vmatprep.subr.mxu1 %v1169_v9  ;;  %v1882_v8 = vld [vmem:[#allocation23_spill] sm:$0xff]  ;;  %v1883_v9 = vld [vmem:[#allocation24_spill] sm:$0xff] }
  0xa6   :  { %573 = vmatpush1.msra.mxu0 %v1175_v10  ;;  %644 = vmatpush1.msra.mxu1 %v1177_v11  ;;  %v1884_v10 = vld [vmem:[#allocation25_spill] sm:$0xff]  ;;  %v1885_v11 = vld [vmem:[#allocation26_spill] sm:$0xff] }
  0xa7   :  { %574 = vmatprep.subr.mxu0 %v1179_v12  ;;  %645 = vmatprep.subr.mxu1 %v1181_v13  ;;  %v1886_v12 = vld [vmem:[#allocation27_spill] sm:$0xff]  ;;  %v1887_v13 = vld [vmem:[#allocation28_spill] sm:$0xff] }
  0xa8   :  { %575 = vmatpush1.msra.mxu0 %v1187_v14  ;;  %646 = vmatpush1.msra.mxu1 %v1189_v15  ;;  %v1888_v14 = vld [vmem:[#allocation29_spill] sm:$0xff]  ;;  %v1889_v15 = vld [vmem:[#allocation30_spill] sm:$0xff] }
  0xa9   :  { %576 = vmatprep.subr.mxu0 %v1191_v16  ;;  %647 = vmatprep.subr.mxu1 %v1193_v17  ;;  %v1890_v16 = vld [vmem:[#allocation31_spill] sm:$0xff]  ;;  %v1891_v17 = vld [vmem:[#allocation32_spill] sm:$0xff] }
  0xaa   :  { %577 = vmatpush1.msra.mxu0 %v1199_v21  ;;  %648 = vmatpush1.msra.mxu1 %v1201_v22 }
  0xab   :  { %578 = vmatprep.subr.mxu0 %v1203_v23  ;;  %649 = vmatprep.subr.mxu1 %v1205_v24 }
  0xac   :  { %579 = vmatpush1.msra.mxu0 %v1211_v27  ;;  %650 = vmatpush1.msra.mxu1 %v1213_v28 }
  0xad   :  { %580 = vmatprep.subr.mxu0 %v1215_v29  ;;  %651 = vmatprep.subr.mxu1 %v1217_v30 }
  0xae   :  { %581 = vmatpush1.msra.mxu0 %v1221_v32  ;;  %652 = vmatpush1.msra.mxu1 %v1223_v33 }
  0xaf   :  { %582 = vmatprep.subr.mxu0 %v1229_v38  ;;  %653 = vmatprep.subr.mxu1 %v1231_v39 }
  0xb0   :  { %583 = vmatpush1.msra.mxu0 %v1249_v44  ;;  %654 = vmatpush1.msra.mxu1 %v1251_v45 }
  0xb1   :  { %584 = vmatprep.subr.mxu0 %v1257_v48  ;;  %655 = vmatprep.subr.mxu1 %v1259_v49 }
  0xb2   :  { %585 = vmatpush1.msra.mxu0 %v1265_v50  ;;  %656 = vmatpush1.msra.mxu1 %v1267_v51 }
  0xb3   :  { %586 = vmatprep.subr.mxu0 %v1269_v52  ;;  %657 = vmatprep.subr.mxu1 %v1271_v53 }
  0xb4   :  { %587 = vmatpush1.msra.mxu0 %v1277_v54  ;;  %658 = vmatpush1.msra.mxu1 %v1279_v55 }
  0xb5   :  { %588 = vmatprep.subr.mxu0 %v1281_v56  ;;  %659 = vmatprep.subr.mxu1 %v1283_v57 }
  0xb6   :  { %589 = vmatpush1.msra.mxu0 %v1289_v58  ;;  %660 = vmatpush1.msra.mxu1 %v1291_v59  ;;  %v1111_v59 = vmov 0.0  }
  0xb7   :  { %590 = vmatprep.subr.mxu0 %v1293_v60  ;;  %661 = vmatprep.subr.mxu1 %v1874_v0  ;;  %v1898_v0 = vld [vmem:[#allocation39_spill] sm:$0xff] }
  0xb8   :  { %591 = vmatpush1.msra.mxu0 %v1875_v1  ;;  %662 = vmatpush1.msra.mxu1 %v1876_v2  ;;  %v1901_v1 = vld [vmem:[#allocation42_spill] sm:$0xff]  ;;  %v1902_v2 = vld [vmem:[#allocation43_spill] sm:$0xff] }
  0xb9   :  { %592 = vmatprep.subr.mxu0 %v1877_v3  ;;  %663 = vmatprep.subr.mxu1 %v1878_v4  ;;  %v1905_v3 = vld [vmem:[#allocation46_spill] sm:$0xff]  ;;  %v1906_v4 = vld [vmem:[#allocation47_spill] sm:$0xff] }
  0xba   :  { %593 = vmatpush1.msra.mxu0 %v1879_v5  ;;  %664 = vmatpush1.msra.mxu1 %v1880_v6  ;;  %v1907_v5 = vld [vmem:[#allocation48_spill] sm:$0xff]  ;;  %v1908_v6 = vld [vmem:[#allocation49_spill] sm:$0xff] }
  0xbb   :  { %594 = vmatprep.subr.mxu0 %v1881_v7  ;;  %665 = vmatprep.subr.mxu1 %v1882_v8  ;;  %v1909_v7 = vld [vmem:[#allocation50_spill] sm:$0xff]  ;;  %v1910_v8 = vld [vmem:[#allocation51_spill] sm:$0xff] }
  0xbc   :  { %595 = vmatpush1.msra.mxu0 %v1883_v9  ;;  %666 = vmatpush1.msra.mxu1 %v1884_v10  ;;  %v1911_v9 = vld [vmem:[#allocation52_spill] sm:$0xff]  ;;  %v1912_v10 = vld [vmem:[#allocation53_spill] sm:$0xff] }
  0xbd   :  { %596 = vmatprep.subr.mxu0 %v1885_v11  ;;  %667 = vmatprep.subr.mxu1 %v1886_v12  ;;  %v1913_v11 = vld [vmem:[#allocation54_spill] sm:$0xff]  ;;  %v1914_v12 = vld [vmem:[#allocation55_spill] sm:$0xff] }
  0xbe   :  { %597 = vmatpush1.msra.mxu0 %v1887_v13  ;;  %668 = vmatpush1.msra.mxu1 %v1888_v14  ;;  %v1915_v13 = vld [vmem:[#allocation56_spill] sm:$0xff]  ;;  %v1916_v14 = vld [vmem:[#allocation57_spill] sm:$0xff] }
  0xbf   :  { %598 = vmatprep.subr.mxu0 %v1889_v15  ;;  %669 = vmatprep.subr.mxu1 %v1890_v16  ;;  %v1917_v15 = vld [vmem:[#allocation58_spill] sm:$0xff]  ;;  %v1918_v16 = vld [vmem:[#allocation59_spill] sm:$0xff] }
  0xc0   :  { %599 = vmatpush1.msra.mxu0 %v1349_v36  ;;  %670 = vmatpush1.msra.mxu1 %v1351_v37  ;;  %v1893_v36 = vld [vmem:[#allocation34_spill] sm:$0xff]  ;;  %v1894_v37 = vld [vmem:[#allocation35_spill] sm:$0xff] }
  0xc1   :  { %710 = vmatprep.subr.mxu0 %v1353_v46  ;;  %781 = vmatprep.subr.mxu1 %v1891_v17  ;;  %v1895_v46 = vld [vmem:[#allocation36_spill] sm:$0xff] }
  0xc2   :  { %632 = vmatprep.mubr.f32.mxu0 %v1111_v59  ;;  %703 = vmatprep.mubr.f32.mxu1 %v1111_v59  ;;  %v1919_v17 = vld [vmem:[#allocation60_spill] sm:$0xff] }
 0x121   :  { %v333_v21 = vpop.f32.mrf.mxu0  ;;  %v403_v22 = vpop.f32.mrf.mxu1 }
 0x122   :  { %v404_v27 = vadd.f32 %v403_v22, %v333_v21  ;;  %v1920_v21 = vld [vmem:[#allocation61_spill] sm:$0xff]  ;;  %v1921_v22 = vld [vmem:[#allocation62_spill] sm:$0xff] }
 0x123   :  { %v335_v23 = vpop.f32.mrf.mxu0  ;;  %v405_v24 = vpop.f32.mrf.mxu1 }
 0x124   :  { %v1922_v23 = vld [vmem:[#allocation63_spill] sm:$0xff]  ;;  %v1923_v24 = vld [vmem:[#allocation64_spill] sm:$0xff] }
 0x161   :  { %v473_v28 = vpop.f32.mrf.mxu0  ;;  %v543_v29 = vpop.f32.mrf.mxu1 }
 0x162   :  { %v474_v30 = vadd.f32 %v473_v28, %v404_v27  ;;  %v1924_v27 = vld [vmem:[#allocation65_spill] sm:$0xff]  ;;  %v1925_v28 = vld [vmem:[#allocation66_spill] sm:$0xff] }
 0x163   :  { %v475_v32 = vpop.f32.mrf.mxu0  ;;  %v545_v33 = vpop.f32.mrf.mxu1 }
 0x164   :  { %v544_v38 = vadd.f32 %v543_v29, %v474_v30  ;;  %v1926_v29 = vld [vmem:[#allocation67_spill] sm:$0xff]  ;;  %v1927_v30 = vld [vmem:[#allocation68_spill] sm:$0xff]  ;;  %v1928_v32 = vld [vmem:[#allocation69_spill] sm:$0xff] }
 0x165   :  { %v1929_v33 = vld [vmem:[#allocation70_spill] sm:$0xff] }
 0x166   :  { %547 = vmax.xlane.f32.xlu0 %v544_v38 }
 0x1ef   :  { %v548_v39 = vpop.xlane.xlu0 %547 }
 0x1f0   :  { %v549_v44 = vsub.f32 %v544_v38, %v548_v39  ;;  %v1930_v38 = vld [vmem:[#allocation71_spill] sm:$0xff]  ;;  %v1931_v39 = vld [vmem:[#allocation72_spill] sm:$0xff] }
 0x1f2   :  { %v550_v45 = vmul.f32 1.442695, %v549_v44  ;;  %v1932_v44 = vld [vmem:[#allocation73_spill] sm:$0xff] }
 0x1f4   :  { %1008 = vpow2.f32 %v550_v45  ;;  %v1933_v45 = vld [vmem:[#allocation74_spill] sm:$0xff] }
 0x201   :  { %v1009_v48 = vpop.eup %1008 }
 0x202   :  { %552 = vadd.xlane.f32.xlu0 %v1009_v48 }
 0x28b   :  { %v553_v49 = vpop.xlane.xlu0 %552 }
 0x28c   :  { %1010 = vrcp.f32 %v553_v49  ;;  %v1935_v49 = vld [vmem:[#allocation76_spill] sm:$0xff] }
 0x299   :  { %v1011_v50 = vpop.eup %1010 }
 0x29a   :  { %v555_v51 = vmul.f32 %v1011_v50, %v1009_v48  ;;  %v1934_v48 = vld [vmem:[#allocation75_spill] sm:$0xff]  ;;  %v1936_v50 = vld [vmem:[#allocation77_spill] sm:$0xff] }
 0x29c   :  { %v983_v52 = vadd.f32 -0.05, %v555_v51 }
 0x29e   :  { %v559_v53 = vand.u32 2147483647, %v983_v52  ;;  %v557_v55 = vmax.f32 %v983_v52, 0.0  ;;  %v1938_v52 = vld [vmem:[#allocation79_spill] sm:$0xff] }
 0x2a0   :  { %v560_v54 = vadd.f32 1e-12, %v559_v53  ;;  %v558_v56 = vmul.f32 %v557_v55, %v555_v51  ;;  %v1937_v51 = vld [vmem:[#allocation78_spill] sm:$0xff]  ;;  %v1939_v53 = vld [vmem:[#allocation80_spill] sm:$0xff] }
 0x2a1   :  { %v1941_v55 = vld [vmem:[#allocation82_spill] sm:$0xff] }
 0x2a2   :  { %1012 = vrcp.f32 %v560_v54  ;;  %v1940_v54 = vld [vmem:[#allocation81_spill] sm:$0xff] }
 0x2af   :  { %v1013_v57 = vpop.eup %1012 }
 0x2b0   :  { %v562_v58 = vmul.f32 %v1013_v57, %v558_v56  ;;  %v1942_v56 = vld [vmem:[#allocation83_spill] sm:$0xff]  ;;  %v1943_v57 = vld [vmem:[#allocation84_spill] sm:$0xff] }
 0x2b2   :  { %563 = vadd.xlane.f32.xlu1 %v562_v58 }
 0x33b   :  { %v564_v60 = vpop.xlane.xlu1 %563 }
 0x33c   :  { %v565_v61 = vmax.f32 %v564_v60, 1e-12 }
 0x33e   :  { %1014 = vrcp.f32 %v565_v61 }
 0x34b   :  { %v1015_v62 = vpop.eup %1014 }
 0x34c   :  { %v1639_v20 = vmul.f32 %v1015_v62, %v562_v58 }
 0x34e   :  { %633 = vmatmul.mubr.f32.vlgmr.msra.gmra.mxu0 %v1639_v20  ;;  %948 = vst [vmem:[#allocation8] sm:$0xff] %v1639_v20  ;;  %704 = vmatmul.mubr.f32.vlgmr.msra.gmra.mxu1 %v1639_v20 }
 0x34f   :  { %711 = vmatpush1.msra.mxu0 %v1377_v19  ;;  %782 = vmatpush1.msra.mxu1 %v1379_v18  ;;  %v1899_v19 = vld [vmem:[#allocation40_spill] sm:$0xff]  ;;  %v1900_v18 = vld [vmem:[#allocation41_spill] sm:$0xff] }
 0x350   :  { %712 = vmatprep.subr.mxu0 %v1892_v34  ;;  %783 = vmatprep.subr.mxu1 %v1893_v36  ;;  %v1944_v34 = vld [vmem:[#allocation14_spill] sm:$0xff] }
 0x351   :  { %713 = vmatpush1.msra.mxu0 %v1393_v42  ;;  %784 = vmatpush1.msra.mxu1 %v1395_v43  ;;  %v1903_v42 = vld [vmem:[#allocation44_spill] sm:$0xff]  ;;  %v1904_v43 = vld [vmem:[#allocation45_spill] sm:$0xff] }
 0x352   :  { %714 = vmatprep.subr.mxu0 %v1894_v37  ;;  %785 = vmatprep.subr.mxu1 %v1895_v46 }
 0x353   :  { %715 = vmatpush1.msra.mxu0 %v1896_v40  ;;  %786 = vmatpush1.msra.mxu1 %v1897_v41 }
 0x354   :  { %716 = vmatprep.subr.mxu0 %v1898_v0  ;;  %787 = vmatprep.subr.mxu1 %v1899_v19 }
 0x355   :  { %717 = vmatpush1.msra.mxu0 %v1900_v18  ;;  %788 = vmatpush1.msra.mxu1 %v1901_v1 }
 0x356   :  { %718 = vmatprep.subr.mxu0 %v1902_v2  ;;  %789 = vmatprep.subr.mxu1 %v1903_v42 }
 0x357   :  { %719 = vmatpush1.msra.mxu0 %v1904_v43  ;;  %790 = vmatpush1.msra.mxu1 %v1905_v3 }
 0x358   :  { %720 = vmatprep.subr.mxu0 %v1906_v4  ;;  %791 = vmatprep.subr.mxu1 %v1907_v5 }
 0x359   :  { %721 = vmatpush1.msra.mxu0 %v1908_v6  ;;  %792 = vmatpush1.msra.mxu1 %v1909_v7 }
 0x35a   :  { %722 = vmatprep.subr.mxu0 %v1910_v8  ;;  %793 = vmatprep.subr.mxu1 %v1911_v9 }
 0x35b   :  { %723 = vmatpush1.msra.mxu0 %v1912_v10  ;;  %794 = vmatpush1.msra.mxu1 %v1913_v11 }
 0x35c   :  { %724 = vmatprep.subr.mxu0 %v1914_v12  ;;  %795 = vmatprep.subr.mxu1 %v1915_v13 }
 0x35d   :  { %725 = vmatpush1.msra.mxu0 %v1916_v14  ;;  %796 = vmatpush1.msra.mxu1 %v1917_v15 }
 0x35e   :  { %726 = vmatprep.subr.mxu0 %v1918_v16  ;;  %797 = vmatprep.subr.mxu1 %v1919_v17 }
 0x35f   :  { %727 = vmatpush1.msra.mxu0 %v1920_v21  ;;  %798 = vmatpush1.msra.mxu1 %v1921_v22 }
 0x360   :  { %728 = vmatprep.subr.mxu0 %v1922_v23  ;;  %799 = vmatprep.subr.mxu1 %v1923_v24 }
 0x361   :  { %729 = vmatpush1.msra.mxu0 %v1924_v27  ;;  %800 = vmatpush1.msra.mxu1 %v1925_v28 }
 0x362   :  { %730 = vmatprep.subr.mxu0 %v1926_v29  ;;  %801 = vmatprep.subr.mxu1 %v1927_v30 }
 0x363   :  { %731 = vmatpush1.msra.mxu0 %v1928_v32  ;;  %802 = vmatpush1.msra.mxu1 %v1929_v33 }
 0x364   :  { %732 = vmatprep.subr.mxu0 %v1930_v38  ;;  %803 = vmatprep.subr.mxu1 %v1931_v39 }
 0x365   :  { %733 = vmatpush1.msra.mxu0 %v1932_v44  ;;  %804 = vmatpush1.msra.mxu1 %v1933_v45 }
 0x366   :  { %734 = vmatprep.subr.mxu0 %v1934_v48  ;;  %805 = vmatprep.subr.mxu1 %v1935_v49 }
 0x367   :  { %735 = vmatpush1.msra.mxu0 %v1936_v50  ;;  %806 = vmatpush1.msra.mxu1 %v1937_v51 }
 0x368   :  { %736 = vmatprep.subr.mxu0 %v1938_v52  ;;  %807 = vmatprep.subr.mxu1 %v1939_v53 }
 0x369   :  { %737 = vmatpush1.msra.mxu0 %v1940_v54  ;;  %808 = vmatpush1.msra.mxu1 %v1941_v55 }
 0x36a   :  { %738 = vmatprep.subr.mxu0 %v1942_v56  ;;  %809 = vmatprep.subr.mxu1 %v1943_v57 }
 0x36b   :  { %739 = vmatpush1.msra.mxu0 %v1549_v25  ;;  %810 = vmatpush1.msra.mxu1 %v1551_v63 }
 0x36c   :  { %740 = vmatprep.subr.mxu0 %v1553_v26  ;;  %811 = vmatprep.subr.mxu1 %v1555_v47 }
 0x36d   :  { %741 = vmatpush1.msra.mxu0 %v1561_v35  ;;  %774 = vmatprep.mubr.f32.mxu0 %v1111_v59 }
 0x36e   :  { %812 = vmatpush1.msra.mxu1 %v1563_v31  ;;  %845 = vmatprep.mubr.f32.mxu1 %v1111_v59 }
 0x36f   :  { %775 = vmatmul.mubr.f32.vlgmr.msra.gmra.mxu0 %v1639_v20  ;;  %846 = vmatmul.mubr.f32.vlgmr.msra.gmra.mxu1 %v1639_v20 }
 0x40e   :  { %v634_v58 = vpop.f32.mrf.mxu0  ;;  %v705_v25 = vpop.f32.mrf.mxu1 }
 0x410   :  { %v636_v60 = vpop.f32.mrf.mxu0  ;;  %v707_v63 = vpop.f32.mrf.mxu1 }
 0x411   :  { %v860_v61 = vcombine.low %v634_v58, %v636_v60  ;;  %v861_v26 = vcombine.high %v634_v58, %v636_v60  ;;  %v862_v62 = vcombine.low %v705_v25, %v707_v63  ;;  %v863_v47 = vcombine.high %v705_v25, %v707_v63 }
 0x413   :  { %v870_v35 = vrot.slane %v860_v61, %v1944_v34  ;;  %v877_v36 = vrot.slane %v861_v26, %v1944_v34  ;;  %v884_v31 = vrot.slane %v862_v62, %v1944_v34  ;;  %v891_v59 = vrot.slane %v863_v47, %v1944_v34 }
 0x415   :  { %v892_v37 = vcombine.low %v870_v35, %v884_v31  ;;  %v893_v46 = vcombine.high %v870_v35, %v884_v31  ;;  %v894_v40 = vcombine.low %v877_v36, %v891_v59  ;;  %v895_v20 = vcombine.high %v877_v36, %v891_v59 }
 0x417   :  { %940 = vst [vmem:[#allocation7] sm:$0xff] %v892_v37  ;;  %942 = vst [vmem:[#allocation7 + $0x10] sm:$0xff] %v893_v46 }
 0x418   :  { %944 = vst [vmem:[#allocation7 + $0x20] sm:$0xff] %v894_v40  ;;  %946 = vst [vmem:[#allocation7 + $0x30] sm:$0xff] %v895_v20 }
 0x42f   :  { %v776_v41 = vpop.f32.mrf.mxu0  ;;  %v847_v0 = vpop.f32.mrf.mxu1 }
 0x431   :  { %v778_v19 = vpop.f32.mrf.mxu0  ;;  %v849_v18 = vpop.f32.mrf.mxu1 }
 0x432   :  { %v896_v1 = vcombine.low %v776_v41, %v778_v19  ;;  %v897_v2 = vcombine.high %v776_v41, %v778_v19  ;;  %v898_v42 = vcombine.low %v847_v0, %v849_v18  ;;  %v899_v43 = vcombine.high %v847_v0, %v849_v18 }
 0x434   :  { %v906_v3 = vrot.slane %v896_v1, %v1944_v34  ;;  %v913_v4 = vrot.slane %v897_v2, %v1944_v34  ;;  %v920_v5 = vrot.slane %v898_v42, %v1944_v34  ;;  %v927_v6 = vrot.slane %v899_v43, %v1944_v34 }
 0x436   :  { %v928_v7 = vcombine.low %v906_v3, %v920_v5  ;;  %v929_v8 = vcombine.high %v906_v3, %v920_v5  ;;  %v930_v9 = vcombine.low %v913_v4, %v927_v6  ;;  %v931_v10 = vcombine.high %v913_v4, %v927_v6 }
 0x438   :  { %941 = vst [vmem:[#allocation7 + $0x8] sm:$0xff] %v928_v7  ;;  %943 = vst [vmem:[#allocation7 + $0x18] sm:$0xff] %v929_v8 }
 0x439   :  { %945 = vst [vmem:[#allocation7 + $0x28] sm:$0xff] %v930_v9  ;;  %947 = vst [vmem:[#allocation7 + $0x38] sm:$0xff] %v931_v10 }
 0x43a   :  { %953 = vsyncadd [#allocation4], 768  ;;  %s1112_s0 = smov [#allocation7]  }
 0x43b   :  { %s954_s1 = sshll.u32 %s1112_s0, 4  ;;  %s955_s1 = int_to_ptr.vmem [resolvable:$true] %s954_s1 }
 0x43c   :  { %s1056_s27 = scalar_lea.vmem %s955_s1, 256  ;;  %s1060_s28 = scalar_lea.vmem %s955_s1, 1024 }
 0x43d   :  { %p1057_p10 = scmp.ne.s32.totalorder %s955_s1, %s1056_s27  ;;  %p1061_p11 = scmp.lt.s32.totalorder %s955_s1, %s955_s1 }
 0x43e   :  { %p1062_p12 = scmp.lt.s32.totalorder %s1060_s28, %s1056_s27 }
 0x440   :  { %p1063_p13 = por %p1062_p12, %p1061_p11 }
 0x442   :  { %p1064_p0 = pnand %p1063_p13, %p1057_p10 }
 0x444   :  { %1067 = shalt.err (!%p1064_p0)
}
 0x445   :  { %960 = dma.vmem_to_hbm [thread:$0]  %s955_s1, 256, %s1729_s2, [#allocation4], %s1105_s16, %s1105_s16, %s1106_s17  }
 0x446   :  { %965 = vsyncadd [#allocation9], 96  ;;  %s1113_s4 = smov [#allocation8]  }
 0x447   :  { %s966_s5 = sshll.u32 %s1113_s4, 4  ;;  %s967_s5 = int_to_ptr.vmem [resolvable:$true] %s966_s5 }
 0x448   :  { %s1076_s6 = scalar_lea.vmem %s967_s5, 32  ;;  %s1080_s7 = scalar_lea.vmem %s967_s5, 128 }
 0x449   :  { %p1077_p1 = scmp.ne.s32.totalorder %s967_s5, %s1076_s6  ;;  %p1081_p2 = scmp.lt.s32.totalorder %s967_s5, %s967_s5 }
 0x44a   :  { %p1082_p3 = scmp.lt.s32.totalorder %s1080_s7, %s1076_s6 }
 0x44c   :  { %p1083_p4 = por %p1082_p3, %p1081_p2 }
 0x44e   :  { %p1084_p5 = pnand %p1083_p4, %p1077_p1 }
 0x450   :  { %1087 = shalt.err (!%p1084_p5)
}
 0x451   :  { %s1114_s8 = smov 32   ;;  %s1115_s9 = smov 2  }
 0x452   :  { %972 = dma.vmem_to_hbm [thread:$0]  %s967_s5, 32, %s1730_s3, [#allocation9], %s1114_s8, %s1114_s8, %s1115_s9  }
 0x453   :  { %1100 = dma.done.wait [#allocation4], 1024  }
 0x454   :  { %1101 = vsyncadd [#allocation4], 4294966272 }
 0x455   :  { %1102 = dma.done.wait [#allocation9], 128  }
 0x456   :  { %1103 = vsyncadd [#allocation9], 4294967168 }
 0x457   :  { %979 = vsyncpa [#allocation3], 1 }
 0x458   :  { %980 = vsyncpa [#allocation6], 1 }
 0x459   :  { %981 = vsyncpa [#allocation4], 1 }
 0x45a   :  { %982 = vsyncpa [#allocation9], 1 }

</bundles_post_ra>
